<compile_context>
chip_gen: v6e
topology: v6e:2x2x1
jax: 0.10.0
libtpu: 0.0.40
codegen_flags: <defaults>
</compile_context>

<pallas_src>
import jax
import jax.numpy as jnp
from jax.experimental import pallas as pl
from jax.experimental.pallas import tpu as pltpu

# ---------------- model sizes ----------------
T = 8          # time steps
B = 2          # batch
D_OBS = 16     # observation dim (observation_shape=(16,))
A = 4          # action_size
H1 = 32        # hidden_sizes[0]
H2 = 32        # hidden_sizes[1]
L = 32         # lstm_size (last_size after LSTM)
NH = A + 2     # fused head width: [mu (A) | value (1) | constraint (1)]
VAR_CLIP = 1e-6

# ---- packed input slab (T*B, X_COLS): [obs | act | rew | 1 | pad] ----
X_COLS = 32

# ---- packed parameter slab row offsets (all 8-row aligned, 128 lanes) ----
R_VEC = 0                    # row 0: obs_mean, row 1: obs_var, row 2: b1,
#                              row 3: b2, row 4: b_head, rows 5-7: pad
R_W1 = 8                     # (D_OBS, H1) in lanes 0:H1
R_W2 = R_W1 + D_OBS          # (H1, H2)   in lanes 0:H2
R_WIHFC = R_W2 + H1          # (H2, 4L)
R_ARB = R_WIHFC + H2         # rows 0:A wih_a, row A wih_r, row A+1 b_lstm, pad
R_WHH = R_ARB + 8            # (L, 4L)
R_WHEAD = R_WHH + L          # (L, NH) in lanes 0:NH
P_ROWS = R_WHEAD + L         # = 160

OUT_ROWS = 24                # rows 0:16 heads (128 lanes), 16:18 hn, 18:20 cn


# ---------------- Pallas kernel (single invocation, no grid) ----------------
def cppo_kernel(x_ref, p_ref, out_ref):
    # ---- unpack input slab ----
    x = x_ref[...]                               # (T*B, 32)
    obs = x[:, :D_OBS]                           # (T*B, 16)
    arb = x[:, D_OBS:D_OBS + 8]                  # (T*B, 8) = [act(4)|rew|1|0|0]

    # ---- static slices of the packed parameter slab ----
    mean = p_ref[R_VEC:R_VEC + 1, :D_OBS]        # (1, 16)
    var = p_ref[R_VEC + 1:R_VEC + 2, :D_OBS]     # (1, 16)
    b1 = p_ref[R_VEC + 2:R_VEC + 3, :H1]         # (1, 32)
    b2 = p_ref[R_VEC + 3:R_VEC + 4, :H2]         # (1, 32)
    b_head = p_ref[R_VEC + 4:R_VEC + 5, :]       # (1, 128), zeros beyond NH
    w1 = p_ref[R_W1:R_W1 + D_OBS, :H1]           # (16, 32)
    w2 = p_ref[R_W2:R_W2 + H1, :H2]              # (32, 32)
    wih_fc = p_ref[R_WIHFC:R_WIHFC + H2, :]      # (32, 128)
    w_arb = p_ref[R_ARB:R_ARB + 8, :]            # (8, 128): [wih_a; wih_r; b; 0; 0]
    whh = p_ref[R_WHH:R_WHH + L, :]              # (32, 128)
    w_head = p_ref[R_WHEAD:R_WHEAD + L, :]       # (32, 128), zeros beyond NH

    # ---- observation normalization (batched over all T*B rows) ----
    inv_std = jax.lax.rsqrt(jnp.maximum(var, VAR_CLIP))
    norm = jnp.clip((obs - mean) * inv_std, -10.0, 10.0)

    # ---- MLP body: two tanh Linear layers, batched over T*B ----
    x1 = jnp.tanh(jnp.dot(norm, w1, preferred_element_type=jnp.float32) + b1)
    fc = jnp.tanh(jnp.dot(x1, w2, preferred_element_type=jnp.float32) + b2)   # (T*B, 32)

    # ---- input-dependent LSTM gate contributions (incl. bias via ones col) ----
    gates_pre = (
        jnp.dot(fc, wih_fc, preferred_element_type=jnp.float32)
        + jnp.dot(arb, w_arb, preferred_element_type=jnp.float32)
    )                                                                          # (T*B, 4L)

    # ---- LSTM recurrence (PyTorch gate order i, f, g, o), fully unrolled ----
    # init_rnn_state=None -> zero initial state. Per-step h kept in vregs.
    h = jnp.zeros((B, L), jnp.float32)
    c = jnp.zeros((B, L), jnp.float32)
    hs = []
    for t in range(T):                   # static unroll; body = 1 matmul + gates
        g = gates_pre[t * B:(t + 1) * B, :] + jnp.dot(
            h, whh, preferred_element_type=jnp.float32
        )                                                                      # (B, 4L)
        sg = jax.nn.sigmoid(g)           # one EUP pass for i, f, o
        tg = jnp.tanh(g)                 # one EUP pass for g
        i_g = sg[:, 0 * L:1 * L]
        f_g = sg[:, 1 * L:2 * L]
        o_g = sg[:, 3 * L:4 * L]
        g_g = tg[:, 2 * L:3 * L]
        c = f_g * c + i_g * g_g
        h = o_g * jnp.tanh(c)
        hs.append(h)

    lstm_out = jnp.concatenate(hs, axis=0)                                     # (T*B, L)

    # ---- lstm_skip=True: fc_x = fc_x + lstm_out; fused heads, batched ----
    xfc = fc + lstm_out
    head = jnp.dot(xfc, w_head, preferred_element_type=jnp.float32) + b_head   # (T*B, 128)
    # mu nonlinearity (tanh) applies only to the first A columns; value /
    # constraint columns (and the zero padding) stay linear.
    col = jax.lax.broadcasted_iota(jnp.int32, head.shape, 1)
    out_ref[0:T * B, :] = jnp.where(col < A, jnp.tanh(head), head)             # full-lane store

    # final LSTM state written exactly once into the same output slab
    out_ref[T * B:T * B + 2 * B, :L] = jnp.concatenate([h, c], axis=0)


# ---------------- parameter packing (run ONCE, outside the jitted forward) ---
def pack_params(p):
    """Packs all CppoModel parameters into one (160, 128) f32 slab."""

    def pad128(w):
        return jnp.pad(w.astype(jnp.float32), ((0, 0), (0, 128 - w.shape[1])))

    vec = jnp.zeros((8, 128), jnp.float32)
    vec = vec.at[0, :D_OBS].set(p["obs_mean"][0])
    vec = vec.at[1, :].set(1.0)
    vec = vec.at[1, :D_OBS].set(p["obs_var"][0])
    vec = vec.at[2, :H1].set(p["b1"][0])
    vec = vec.at[3, :H2].set(p["b2"][0])
    b_head = jnp.concatenate([p["b_mu"][0], p["b_v"][0], p["b_c"][0]])
    vec = vec.at[4, :NH].set(b_head)

    arb = jnp.zeros((8, 128), jnp.float32)
    arb = arb.at[0:A, :].set(p["wih_a"])
    arb = arb.at[A, :].set(p["wih_r"][0])
    arb = arb.at[A + 1, :].set(p["b_lstm"][0])

    w_head = jnp.concatenate([p["w_mu"], p["w_v"], p["w_c"]], axis=1)  # (L, NH)

    slab = jnp.concatenate(
        [
            vec,                 # rows   0:8
            pad128(p["w1"]),     # rows   8:24
            pad128(p["w2"]),     # rows  24:56
            p["wih_fc"],         # rows  56:88
            arb,                 # rows  88:96
            p["whh"],            # rows  96:128
            pad128(w_head),      # rows 128:160
        ],
        axis=0,
    )
    assert slab.shape == (P_ROWS, 128)
    return slab


# ---------------- wrapper ----------------
@jax.jit
def cppo_forward(observation, prev_action, prev_reward, param_slab, log_std):
    """Runs the CppoModel forward pass.

    Returns (mu, log_std, value, c_value, (hn, cn)).
    """
    obs_flat = observation.reshape(T * B, D_OBS)
    act_flat = prev_action.reshape(T * B, A)
    rew_flat = prev_reward.reshape(T * B, 1)
    ones = jnp.ones((T * B, 1), jnp.float32)
    pad = jnp.zeros((T * B, X_COLS - D_OBS - A - 2), jnp.float32)
    x_slab = jnp.concatenate([obs_flat, act_flat, rew_flat, ones, pad], axis=1)

    out = pl.pallas_call(
        cppo_kernel,
        out_shape=jax.ShapeDtypeStruct((OUT_ROWS, 128), jnp.float32),
        cost_estimate=pl.CostEstimate(
            flops=500_000, transcendentals=8_000, bytes_accessed=96_000
        ),
    )(x_slab, param_slab)

    heads = out[:T * B]
    mu = heads[:, :A].reshape(T, B, A)
    value = heads[:, A].reshape(T, B)
    c_value = heads[:, A + 1].reshape(T, B)
    hn = out[T * B:T * B + B, :L]
    cn = out[T * B + B:T * B + 2 * B, :L]
    # log_std = self.log_std.repeat(T*B, 1) restored to (T, B, A): broadcast glue.
    log_std_out = jnp.broadcast_to(log_std[None, None, :], (T, B, A))
    # PyTorch LSTM returns (num_layers=1, B, L) states.
    return mu, log_std_out, value, c_value, (hn[None], cn[None])


# ---------------- pure-JAX reference (for correctness check) ----------------
def cppo_reference(observation, prev_action, prev_reward, params):
    var = jnp.maximum(params["obs_var"], VAR_CLIP)
    obs = jnp.clip(
        (observation - params["obs_mean"][0]) / jnp.sqrt(var[0]), -10.0, 10.0
    )
    x = obs.reshape(T * B, D_OBS)
    x = jnp.tanh(x @ params["w1"] + params["b1"][0])
    fc = jnp.tanh(x @ params["w2"] + params["b2"][0])
    fc_tb = fc.reshape(T, B, H2)
    lstm_in = jnp.concatenate(
        [fc_tb, prev_action, prev_reward.reshape(T, B, 1)], axis=2
    )
    wih = jnp.concatenate(
        [params["wih_fc"], params["wih_a"], params["wih_r"]], axis=0
    )

    def step(carry, xt):
        h, c = carry
        gates = xt @ wih + h @ params["whh"] + params["b_lstm"][0]
        i = jax.nn.sigmoid(gates[:, 0 * L:1 * L])
        f = jax.nn.sigmoid(gates[:, 1 * L:2 * L])
        g = jnp.tanh(gates[:, 2 * L:3 * L])
        o = jax.nn.sigmoid(gates[:, 3 * L:4 * L])
        c_new = f * c + i * g
        h_new = o * jnp.tanh(c_new)
        return (h_new, c_new), h_new

    (hn, cn), lstm_out = jax.lax.scan(
        step, (jnp.zeros((B, L)), jnp.zeros((B, L))), lstm_in
    )
    fcx = fc + lstm_out.reshape(T * B, L)
    mu = jnp.tanh(fcx @ params["w_mu"] + params["b_mu"][0]).reshape(T, B, A)
    v = (fcx @ params["w_v"] + params["b_v"][0]).reshape(T, B)
    c = (fcx @ params["w_c"] + params["b_c"][0]).reshape(T, B)
    log_std = jnp.broadcast_to(params["log_std"][None, None, :], (T, B, A))
    return mu, log_std, v, c, (hn[None], cn[None])


# ---------------- parameter init (deterministic, synthetic) ----------------
def make_params(key):
    ks = jax.random.split(key, 16)

    def w(k, shape, scale=0.1):
        return (scale * jax.random.normal(k, shape)).astype(jnp.float32)

    params = {
        # RunningMeanStdModel stats
        "obs_mean": w(ks[0], (1, D_OBS), 0.05),
        "obs_var": (jnp.abs(w(ks[1], (1, D_OBS), 0.5)) + 0.5).astype(jnp.float32),
        # MLP body
        "w1": w(ks[2], (D_OBS, H1)),
        "b1": jnp.zeros((1, H1), jnp.float32),
        "w2": w(ks[3], (H1, H2)),
        "b2": jnp.zeros((1, H2), jnp.float32),
        # LSTM: W_ih split by input source [fc | action | reward], gate order i,f,g,o
        "wih_fc": w(ks[4], (H2, 4 * L)),
        "wih_a": w(ks[5], (A, 4 * L)),
        "wih_r": w(ks[6], (1, 4 * L)),
        "whh": w(ks[7], (L, 4 * L)),
        "b_lstm": w(ks[8], (1, 4 * L), 0.05),   # b_ih + b_hh combined
        # heads
        "w_mu": w(ks[9], (L, A)),
        "b_mu": jnp.zeros((1, A), jnp.float32),
        "w_v": w(ks[10], (L, 1)),
        "b_v": jnp.zeros((1, 1), jnp.float32),
        "w_c": w(ks[11], (L, 1)),
        "b_c": jnp.zeros((1, 1), jnp.float32),
        # log_std parameter (init_log_std = 0.0)
        "log_std": jnp.zeros((A,), jnp.float32),
    }
    return params


if __name__ == "__main__":
    key = jax.random.PRNGKey(0)
    k_obs, k_act, k_rew, k_par = jax.random.split(key, 4)

    observation = jax.random.normal(k_obs, (T, B, D_OBS), jnp.float32)
    prev_action = jax.random.normal(k_act, (T, B, A), jnp.float32)
    prev_reward = jax.random.normal(k_rew, (T, B), jnp.float32)
    params = make_params(k_par)

    # One-time parameter packing (hoisted out of the per-call jitted forward).
    param_slab = jax.block_until_ready(pack_params(params))

    out = cppo_forward(observation, prev_action, prev_reward, param_slab,
                       params["log_std"])
    out = jax.block_until_ready(out)
    mu, log_std, v, c, (hn, cn) = out

    # reference check
    ref = cppo_reference(observation, prev_action, prev_reward, params)
    for got, want in zip((mu, log_std, v, c, hn, cn),
                         (ref[0], ref[1], ref[2], ref[3], ref[4][0], ref[4][1])):
        assert got.shape == want.shape, (got.shape, want.shape)
        assert jnp.allclose(got, want, atol=1e-4, rtol=1e-4), float(
            jnp.max(jnp.abs(got - want))
        )

    print("KERNEL_OK")
</pallas_src>

<mosaic_0001>
module attributes {stable_mosaic.version = 11 : i64} {
  func.func @cppo_kernel(%arg0: memref<16x32xf32, #tpu.memory_space<vmem>>, %arg1: memref<160x128xf32, #tpu.memory_space<vmem>>, %arg2: memref<24x128xf32, #tpu.memory_space<vmem>>) attributes {dimension_semantics = [], scalar_prefetch = 0 : i64, scratch_operands = 0 : i64, tpu.core_type = #tpu.core_type<tc>} {
    %c0 = arith.constant 0 : index
    %c0_0 = arith.constant 0 : index
    %0 = vector.load %arg0[%c0, %c0_0] : memref<16x32xf32, #tpu.memory_space<vmem>>, vector<16x32xf32>
    %1 = vector.extract_strided_slice %0 {offsets = [0, 0], sizes = [16, 16], strides = [1, 1]} : vector<16x32xf32> to vector<16x16xf32>
    %2 = vector.extract_strided_slice %0 {offsets = [0, 16], sizes = [16, 8], strides = [1, 1]} : vector<16x32xf32> to vector<16x8xf32>
    %c0_1 = arith.constant 0 : index
    %c0_2 = arith.constant 0 : index
    %3 = vector.load %arg1[%c0_1, %c0_2] : memref<160x128xf32, #tpu.memory_space<vmem>>, vector<1x16xf32>
    %c1 = arith.constant 1 : index
    %c0_3 = arith.constant 0 : index
    %4 = vector.load %arg1[%c1, %c0_3] : memref<160x128xf32, #tpu.memory_space<vmem>>, vector<1x16xf32>
    %c2 = arith.constant 2 : index
    %c0_4 = arith.constant 0 : index
    %5 = vector.load %arg1[%c2, %c0_4] : memref<160x128xf32, #tpu.memory_space<vmem>>, vector<1x32xf32>
    %c3 = arith.constant 3 : index
    %c0_5 = arith.constant 0 : index
    %6 = vector.load %arg1[%c3, %c0_5] : memref<160x128xf32, #tpu.memory_space<vmem>>, vector<1x32xf32>
    %c4 = arith.constant 4 : index
    %c0_6 = arith.constant 0 : index
    %7 = vector.load %arg1[%c4, %c0_6] : memref<160x128xf32, #tpu.memory_space<vmem>>, vector<1x128xf32>
    %c8 = arith.constant 8 : index
    %c0_7 = arith.constant 0 : index
    %8 = vector.load %arg1[%c8, %c0_7] : memref<160x128xf32, #tpu.memory_space<vmem>>, vector<16x32xf32>
    %c24 = arith.constant 24 : index
    %c0_8 = arith.constant 0 : index
    %9 = vector.load %arg1[%c24, %c0_8] : memref<160x128xf32, #tpu.memory_space<vmem>>, vector<32x32xf32>
    %c56 = arith.constant 56 : index
    %c0_9 = arith.constant 0 : index
    %10 = vector.load %arg1[%c56, %c0_9] : memref<160x128xf32, #tpu.memory_space<vmem>>, vector<32x128xf32>
    %c88 = arith.constant 88 : index
    %c0_10 = arith.constant 0 : index
    %11 = vector.load %arg1[%c88, %c0_10] : memref<160x128xf32, #tpu.memory_space<vmem>>, vector<8x128xf32>
    %c96 = arith.constant 96 : index
    %c0_11 = arith.constant 0 : index
    %12 = vector.load %arg1[%c96, %c0_11] : memref<160x128xf32, #tpu.memory_space<vmem>>, vector<32x128xf32>
    %c128 = arith.constant 128 : index
    %c0_12 = arith.constant 0 : index
    %13 = vector.load %arg1[%c128, %c0_12] : memref<160x128xf32, #tpu.memory_space<vmem>>, vector<32x128xf32>
    %cst = arith.constant 9.99999997E-7 : f32
    %14 = vector.broadcast %cst : f32 to vector<1x16xf32>
    %15 = arith.maximumf %4, %14 : vector<1x16xf32>
    %16 = math.rsqrt %15 : vector<1x16xf32>
    %17 = vector.broadcast %3 : vector<1x16xf32> to vector<16x16xf32>
    %18 = arith.subf %1, %17 : vector<16x16xf32>
    %19 = vector.broadcast %16 : vector<1x16xf32> to vector<16x16xf32>
    %20 = arith.mulf %18, %19 : vector<16x16xf32>
    %cst_13 = arith.constant -1.000000e+01 : f32
    %cst_14 = arith.constant 1.000000e+01 : f32
    %21 = vector.broadcast %cst_13 : f32 to vector<16x16xf32>
    %22 = arith.maximumf %21, %20 : vector<16x16xf32>
    %23 = vector.broadcast %cst_14 : f32 to vector<16x16xf32>
    %24 = arith.minimumf %23, %22 : vector<16x16xf32>
    %cst_15 = arith.constant dense<0.000000e+00> : vector<16x32xf32>
    %25 = tpu.matmul %24, %8, %cst_15 {dimension_numbers = #tpu.dot_dimension_numbers<[1], [0], [0], [1], [0, 0, 1, 1], [], []>} : vector<16x16xf32>, vector<16x32xf32>, vector<16x32xf32> -> vector<16x32xf32>
    %26 = vector.broadcast %5 : vector<1x32xf32> to vector<16x32xf32>
    %27 = arith.addf %25, %26 : vector<16x32xf32>
    %28 = math.tanh %27 : vector<16x32xf32>
    %cst_16 = arith.constant dense<0.000000e+00> : vector<16x32xf32>
    %29 = tpu.matmul %28, %9, %cst_16 {dimension_numbers = #tpu.dot_dimension_numbers<[1], [0], [0], [1], [0, 0, 1, 1], [], []>} : vector<16x32xf32>, vector<32x32xf32>, vector<16x32xf32> -> vector<16x32xf32>
    %30 = vector.broadcast %6 : vector<1x32xf32> to vector<16x32xf32>
    %31 = arith.addf %29, %30 : vector<16x32xf32>
    %32 = math.tanh %31 : vector<16x32xf32>
    %cst_17 = arith.constant dense<0.000000e+00> : vector<16x128xf32>
    %33 = tpu.matmul %32, %10, %cst_17 {dimension_numbers = #tpu.dot_dimension_numbers<[1], [0], [0], [1], [0, 0, 1, 1], [], []>} : vector<16x32xf32>, vector<32x128xf32>, vector<16x128xf32> -> vector<16x128xf32>
    %cst_18 = arith.constant dense<0.000000e+00> : vector<16x128xf32>
    %34 = tpu.matmul %2, %11, %cst_18 {dimension_numbers = #tpu.dot_dimension_numbers<[1], [0], [0], [1], [0, 0, 1, 1], [], []>} : vector<16x8xf32>, vector<8x128xf32>, vector<16x128xf32> -> vector<16x128xf32>
    %35 = arith.addf %33, %34 : vector<16x128xf32>
    %cst_19 = arith.constant 0.000000e+00 : f32
    %36 = vector.broadcast %cst_19 : f32 to vector<2x32xf32>
    %cst_20 = arith.constant 0.000000e+00 : f32
    %37 = vector.broadcast %cst_20 : f32 to vector<2x32xf32>
    %38 = vector.extract_strided_slice %35 {offsets = [0, 0], sizes = [2, 128], strides = [1, 1]} : vector<16x128xf32> to vector<2x128xf32>
    %cst_21 = arith.constant dense<0.000000e+00> : vector<2x128xf32>
    %39 = tpu.matmul %36, %12, %cst_21 {dimension_numbers = #tpu.dot_dimension_numbers<[1], [0], [0], [1], [0, 0, 1, 1], [], []>} : vector<2x32xf32>, vector<32x128xf32>, vector<2x128xf32> -> vector<2x128xf32>
    %40 = arith.addf %38, %39 : vector<2x128xf32>
    %41 = arith.negf %40 : vector<2x128xf32>
    %42 = math.exp %41 : vector<2x128xf32>
    %cst_22 = arith.constant 1.000000e+00 : f32
    %43 = vector.broadcast %cst_22 : f32 to vector<2x128xf32>
    %44 = arith.addf %43, %42 : vector<2x128xf32>
    %45 = arith.divf %43, %44 : vector<2x128xf32>
    %46 = math.tanh %40 : vector<2x128xf32>
    %47 = vector.extract_strided_slice %45 {offsets = [0, 0], sizes = [2, 32], strides = [1, 1]} : vector<2x128xf32> to vector<2x32xf32>
    %48 = vector.extract_strided_slice %45 {offsets = [0, 32], sizes = [2, 32], strides = [1, 1]} : vector<2x128xf32> to vector<2x32xf32>
    %49 = vector.extract_strided_slice %45 {offsets = [0, 96], sizes = [2, 32], strides = [1, 1]} : vector<2x128xf32> to vector<2x32xf32>
    %50 = vector.extract_strided_slice %46 {offsets = [0, 64], sizes = [2, 32], strides = [1, 1]} : vector<2x128xf32> to vector<2x32xf32>
    %51 = arith.mulf %48, %37 : vector<2x32xf32>
    %52 = arith.mulf %47, %50 : vector<2x32xf32>
    %53 = arith.addf %51, %52 : vector<2x32xf32>
    %54 = math.tanh %53 : vector<2x32xf32>
    %55 = arith.mulf %49, %54 : vector<2x32xf32>
    %56 = vector.extract_strided_slice %35 {offsets = [2, 0], sizes = [2, 128], strides = [1, 1]} : vector<16x128xf32> to vector<2x128xf32>
    %cst_23 = arith.constant dense<0.000000e+00> : vector<2x128xf32>
    %57 = tpu.matmul %55, %12, %cst_23 {dimension_numbers = #tpu.dot_dimension_numbers<[1], [0], [0], [1], [0, 0, 1, 1], [], []>} : vector<2x32xf32>, vector<32x128xf32>, vector<2x128xf32> -> vector<2x128xf32>
    %58 = arith.addf %56, %57 : vector<2x128xf32>
    %59 = arith.negf %58 : vector<2x128xf32>
    %60 = math.exp %59 : vector<2x128xf32>
    %cst_24 = arith.constant 1.000000e+00 : f32
    %61 = vector.broadcast %cst_24 : f32 to vector<2x128xf32>
    %62 = arith.addf %61, %60 : vector<2x128xf32>
    %63 = arith.divf %61, %62 : vector<2x128xf32>
    %64 = math.tanh %58 : vector<2x128xf32>
    %65 = vector.extract_strided_slice %63 {offsets = [0, 0], sizes = [2, 32], strides = [1, 1]} : vector<2x128xf32> to vector<2x32xf32>
    %66 = vector.extract_strided_slice %63 {offsets = [0, 32], sizes = [2, 32], strides = [1, 1]} : vector<2x128xf32> to vector<2x32xf32>
    %67 = vector.extract_strided_slice %63 {offsets = [0, 96], sizes = [2, 32], strides = [1, 1]} : vector<2x128xf32> to vector<2x32xf32>
    %68 = vector.extract_strided_slice %64 {offsets = [0, 64], sizes = [2, 32], strides = [1, 1]} : vector<2x128xf32> to vector<2x32xf32>
    %69 = arith.mulf %66, %53 : vector<2x32xf32>
    %70 = arith.mulf %65, %68 : vector<2x32xf32>
    %71 = arith.addf %69, %70 : vector<2x32xf32>
    %72 = math.tanh %71 : vector<2x32xf32>
    %73 = arith.mulf %67, %72 : vector<2x32xf32>
    %74 = vector.extract_strided_slice %35 {offsets = [4, 0], sizes = [2, 128], strides = [1, 1]} : vector<16x128xf32> to vector<2x128xf32>
    %cst_25 = arith.constant dense<0.000000e+00> : vector<2x128xf32>
    %75 = tpu.matmul %73, %12, %cst_25 {dimension_numbers = #tpu.dot_dimension_numbers<[1], [0], [0], [1], [0, 0, 1, 1], [], []>} : vector<2x32xf32>, vector<32x128xf32>, vector<2x128xf32> -> vector<2x128xf32>
    %76 = arith.addf %74, %75 : vector<2x128xf32>
    %77 = arith.negf %76 : vector<2x128xf32>
    %78 = math.exp %77 : vector<2x128xf32>
    %cst_26 = arith.constant 1.000000e+00 : f32
    %79 = vector.broadcast %cst_26 : f32 to vector<2x128xf32>
    %80 = arith.addf %79, %78 : vector<2x128xf32>
    %81 = arith.divf %79, %80 : vector<2x128xf32>
    %82 = math.tanh %76 : vector<2x128xf32>
    %83 = vector.extract_strided_slice %81 {offsets = [0, 0], sizes = [2, 32], strides = [1, 1]} : vector<2x128xf32> to vector<2x32xf32>
    %84 = vector.extract_strided_slice %81 {offsets = [0, 32], sizes = [2, 32], strides = [1, 1]} : vector<2x128xf32> to vector<2x32xf32>
    %85 = vector.extract_strided_slice %81 {offsets = [0, 96], sizes = [2, 32], strides = [1, 1]} : vector<2x128xf32> to vector<2x32xf32>
    %86 = vector.extract_strided_slice %82 {offsets = [0, 64], sizes = [2, 32], strides = [1, 1]} : vector<2x128xf32> to vector<2x32xf32>
    %87 = arith.mulf %84, %71 : vector<2x32xf32>
    %88 = arith.mulf %83, %86 : vector<2x32xf32>
    %89 = arith.addf %87, %88 : vector<2x32xf32>
    %90 = math.tanh %89 : vector<2x32xf32>
    %91 = arith.mulf %85, %90 : vector<2x32xf32>
    %92 = vector.extract_strided_slice %35 {offsets = [6, 0], sizes = [2, 128], strides = [1, 1]} : vector<16x128xf32> to vector<2x128xf32>
    %cst_27 = arith.constant dense<0.000000e+00> : vector<2x128xf32>
    %93 = tpu.matmul %91, %12, %cst_27 {dimension_numbers = #tpu.dot_dimension_numbers<[1], [0], [0], [1], [0, 0, 1, 1], [], []>} : vector<2x32xf32>, vector<32x128xf32>, vector<2x128xf32> -> vector<2x128xf32>
    %94 = arith.addf %92, %93 : vector<2x128xf32>
    %95 = arith.negf %94 : vector<2x128xf32>
    %96 = math.exp %95 : vector<2x128xf32>
    %cst_28 = arith.constant 1.000000e+00 : f32
    %97 = vector.broadcast %cst_28 : f32 to vector<2x128xf32>
    %98 = arith.addf %97, %96 : vector<2x128xf32>
    %99 = arith.divf %97, %98 : vector<2x128xf32>
    %100 = math.tanh %94 : vector<2x128xf32>
    %101 = vector.extract_strided_slice %99 {offsets = [0, 0], sizes = [2, 32], strides = [1, 1]} : vector<2x128xf32> to vector<2x32xf32>
    %102 = vector.extract_strided_slice %99 {offsets = [0, 32], sizes = [2, 32], strides = [1, 1]} : vector<2x128xf32> to vector<2x32xf32>
    %103 = vector.extract_strided_slice %99 {offsets = [0, 96], sizes = [2, 32], strides = [1, 1]} : vector<2x128xf32> to vector<2x32xf32>
    %104 = vector.extract_strided_slice %100 {offsets = [0, 64], sizes = [2, 32], strides = [1, 1]} : vector<2x128xf32> to vector<2x32xf32>
    %105 = arith.mulf %102, %89 : vector<2x32xf32>
    %106 = arith.mulf %101, %104 : vector<2x32xf32>
    %107 = arith.addf %105, %106 : vector<2x32xf32>
    %108 = math.tanh %107 : vector<2x32xf32>
    %109 = arith.mulf %103, %108 : vector<2x32xf32>
    %110 = vector.extract_strided_slice %35 {offsets = [8, 0], sizes = [2, 128], strides = [1, 1]} : vector<16x128xf32> to vector<2x128xf32>
    %cst_29 = arith.constant dense<0.000000e+00> : vector<2x128xf32>
    %111 = tpu.matmul %109, %12, %cst_29 {dimension_numbers = #tpu.dot_dimension_numbers<[1], [0], [0], [1], [0, 0, 1, 1], [], []>} : vector<2x32xf32>, vector<32x128xf32>, vector<2x128xf32> -> vector<2x128xf32>
    %112 = arith.addf %110, %111 : vector<2x128xf32>
    %113 = arith.negf %112 : vector<2x128xf32>
    %114 = math.exp %113 : vector<2x128xf32>
    %cst_30 = arith.constant 1.000000e+00 : f32
    %115 = vector.broadcast %cst_30 : f32 to vector<2x128xf32>
    %116 = arith.addf %115, %114 : vector<2x128xf32>
    %117 = arith.divf %115, %116 : vector<2x128xf32>
    %118 = math.tanh %112 : vector<2x128xf32>
    %119 = vector.extract_strided_slice %117 {offsets = [0, 0], sizes = [2, 32], strides = [1, 1]} : vector<2x128xf32> to vector<2x32xf32>
    %120 = vector.extract_strided_slice %117 {offsets = [0, 32], sizes = [2, 32], strides = [1, 1]} : vector<2x128xf32> to vector<2x32xf32>
    %121 = vector.extract_strided_slice %117 {offsets = [0, 96], sizes = [2, 32], strides = [1, 1]} : vector<2x128xf32> to vector<2x32xf32>
    %122 = vector.extract_strided_slice %118 {offsets = [0, 64], sizes = [2, 32], strides = [1, 1]} : vector<2x128xf32> to vector<2x32xf32>
    %123 = arith.mulf %120, %107 : vector<2x32xf32>
    %124 = arith.mulf %119, %122 : vector<2x32xf32>
    %125 = arith.addf %123, %124 : vector<2x32xf32>
    %126 = math.tanh %125 : vector<2x32xf32>
    %127 = arith.mulf %121, %126 : vector<2x32xf32>
    %128 = vector.extract_strided_slice %35 {offsets = [10, 0], sizes = [2, 128], strides = [1, 1]} : vector<16x128xf32> to vector<2x128xf32>
    %cst_31 = arith.constant dense<0.000000e+00> : vector<2x128xf32>
    %129 = tpu.matmul %127, %12, %cst_31 {dimension_numbers = #tpu.dot_dimension_numbers<[1], [0], [0], [1], [0, 0, 1, 1], [], []>} : vector<2x32xf32>, vector<32x128xf32>, vector<2x128xf32> -> vector<2x128xf32>
    %130 = arith.addf %128, %129 : vector<2x128xf32>
    %131 = arith.negf %130 : vector<2x128xf32>
    %132 = math.exp %131 : vector<2x128xf32>
    %cst_32 = arith.constant 1.000000e+00 : f32
    %133 = vector.broadcast %cst_32 : f32 to vector<2x128xf32>
    %134 = arith.addf %133, %132 : vector<2x128xf32>
    %135 = arith.divf %133, %134 : vector<2x128xf32>
    %136 = math.tanh %130 : vector<2x128xf32>
    %137 = vector.extract_strided_slice %135 {offsets = [0, 0], sizes = [2, 32], strides = [1, 1]} : vector<2x128xf32> to vector<2x32xf32>
    %138 = vector.extract_strided_slice %135 {offsets = [0, 32], sizes = [2, 32], strides = [1, 1]} : vector<2x128xf32> to vector<2x32xf32>
    %139 = vector.extract_strided_slice %135 {offsets = [0, 96], sizes = [2, 32], strides = [1, 1]} : vector<2x128xf32> to vector<2x32xf32>
    %140 = vector.extract_strided_slice %136 {offsets = [0, 64], sizes = [2, 32], strides = [1, 1]} : vector<2x128xf32> to vector<2x32xf32>
    %141 = arith.mulf %138, %125 : vector<2x32xf32>
    %142 = arith.mulf %137, %140 : vector<2x32xf32>
    %143 = arith.addf %141, %142 : vector<2x32xf32>
    %144 = math.tanh %143 : vector<2x32xf32>
    %145 = arith.mulf %139, %144 : vector<2x32xf32>
    %146 = vector.extract_strided_slice %35 {offsets = [12, 0], sizes = [2, 128], strides = [1, 1]} : vector<16x128xf32> to vector<2x128xf32>
    %cst_33 = arith.constant dense<0.000000e+00> : vector<2x128xf32>
    %147 = tpu.matmul %145, %12, %cst_33 {dimension_numbers = #tpu.dot_dimension_numbers<[1], [0], [0], [1], [0, 0, 1, 1], [], []>} : vector<2x32xf32>, vector<32x128xf32>, vector<2x128xf32> -> vector<2x128xf32>
    %148 = arith.addf %146, %147 : vector<2x128xf32>
    %149 = arith.negf %148 : vector<2x128xf32>
    %150 = math.exp %149 : vector<2x128xf32>
    %cst_34 = arith.constant 1.000000e+00 : f32
    %151 = vector.broadcast %cst_34 : f32 to vector<2x128xf32>
    %152 = arith.addf %151, %150 : vector<2x128xf32>
    %153 = arith.divf %151, %152 : vector<2x128xf32>
    %154 = math.tanh %148 : vector<2x128xf32>
    %155 = vector.extract_strided_slice %153 {offsets = [0, 0], sizes = [2, 32], strides = [1, 1]} : vector<2x128xf32> to vector<2x32xf32>
    %156 = vector.extract_strided_slice %153 {offsets = [0, 32], sizes = [2, 32], strides = [1, 1]} : vector<2x128xf32> to vector<2x32xf32>
    %157 = vector.extract_strided_slice %153 {offsets = [0, 96], sizes = [2, 32], strides = [1, 1]} : vector<2x128xf32> to vector<2x32xf32>
    %158 = vector.extract_strided_slice %154 {offsets = [0, 64], sizes = [2, 32], strides = [1, 1]} : vector<2x128xf32> to vector<2x32xf32>
    %159 = arith.mulf %156, %143 : vector<2x32xf32>
    %160 = arith.mulf %155, %158 : vector<2x32xf32>
    %161 = arith.addf %159, %160 : vector<2x32xf32>
    %162 = math.tanh %161 : vector<2x32xf32>
    %163 = arith.mulf %157, %162 : vector<2x32xf32>
    %164 = vector.extract_strided_slice %35 {offsets = [14, 0], sizes = [2, 128], strides = [1, 1]} : vector<16x128xf32> to vector<2x128xf32>
    %cst_35 = arith.constant dense<0.000000e+00> : vector<2x128xf32>
    %165 = tpu.matmul %163, %12, %cst_35 {dimension_numbers = #tpu.dot_dimension_numbers<[1], [0], [0], [1], [0, 0, 1, 1], [], []>} : vector<2x32xf32>, vector<32x128xf32>, vector<2x128xf32> -> vector<2x128xf32>
    %166 = arith.addf %164, %165 : vector<2x128xf32>
    %167 = arith.negf %166 : vector<2x128xf32>
    %168 = math.exp %167 : vector<2x128xf32>
    %cst_36 = arith.constant 1.000000e+00 : f32
    %169 = vector.broadcast %cst_36 : f32 to vector<2x128xf32>
    %170 = arith.addf %169, %168 : vector<2x128xf32>
    %171 = arith.divf %169, %170 : vector<2x128xf32>
    %172 = math.tanh %166 : vector<2x128xf32>
    %173 = vector.extract_strided_slice %171 {offsets = [0, 0], sizes = [2, 32], strides = [1, 1]} : vector<2x128xf32> to vector<2x32xf32>
    %174 = vector.extract_strided_slice %171 {offsets = [0, 32], sizes = [2, 32], strides = [1, 1]} : vector<2x128xf32> to vector<2x32xf32>
    %175 = vector.extract_strided_slice %171 {offsets = [0, 96], sizes = [2, 32], strides = [1, 1]} : vector<2x128xf32> to vector<2x32xf32>
    %176 = vector.extract_strided_slice %172 {offsets = [0, 64], sizes = [2, 32], strides = [1, 1]} : vector<2x128xf32> to vector<2x32xf32>
    %177 = arith.mulf %174, %161 : vector<2x32xf32>
    %178 = arith.mulf %173, %176 : vector<2x32xf32>
    %179 = arith.addf %177, %178 : vector<2x32xf32>
    %180 = math.tanh %179 : vector<2x32xf32>
    %181 = arith.mulf %175, %180 : vector<2x32xf32>
    %182 = tpu.concatenate %55, %73, %91, %109, %127, %145, %163, %181 in 0 : vector<2x32xf32>, vector<2x32xf32>, vector<2x32xf32>, vector<2x32xf32>, vector<2x32xf32>, vector<2x32xf32>, vector<2x32xf32>, vector<2x32xf32> -> vector<16x32xf32>
    %183 = arith.addf %32, %182 : vector<16x32xf32>
    %cst_37 = arith.constant dense<0.000000e+00> : vector<16x128xf32>
    %184 = tpu.matmul %183, %13, %cst_37 {dimension_numbers = #tpu.dot_dimension_numbers<[1], [0], [0], [1], [0, 0, 1, 1], [], []>} : vector<16x32xf32>, vector<32x128xf32>, vector<16x128xf32> -> vector<16x128xf32>
    %185 = vector.broadcast %7 : vector<1x128xf32> to vector<16x128xf32>
    %186 = arith.addf %184, %185 : vector<16x128xf32>
    %187 = tpu.iota {dimensions = array<i32: 1>} : vector<16x128xi32>
    %c4_i32 = arith.constant 4 : i32
    %188 = vector.broadcast %c4_i32 : i32 to vector<16x128xi32>
    %189 = arith.cmpi slt, %187, %188 : vector<16x128xi32>
    %190 = math.tanh %186 : vector<16x128xf32>
    %191 = arith.select %189, %190, %186 : vector<16x128xi1>, vector<16x128xf32>
    %c0_38 = arith.constant 0 : index
    %c0_39 = arith.constant 0 : index
    %192 = vector.load %arg2[%c0_38, %c0_39] : memref<24x128xf32, #tpu.memory_space<vmem>>, vector<16x128xf32>
    tpu.vector_store %arg2[%c0_38, %c0_39], %191 {strides = array<i32>} : memref<24x128xf32, #tpu.memory_space<vmem>>, vector<16x128xf32>,
    %193 = tpu.concatenate %181, %179 in 0 : vector<2x32xf32>, vector<2x32xf32> -> vector<4x32xf32>
    %c16 = arith.constant 16 : index
    %c0_40 = arith.constant 0 : index
    %194 = vector.load %arg2[%c16, %c0_40] : memref<24x128xf32, #tpu.memory_space<vmem>>, vector<4x32xf32>
    tpu.vector_store %arg2[%c16, %c0_40], %193 {strides = array<i32>} : memref<24x128xf32, #tpu.memory_space<vmem>>, vector<4x32xf32>,
    return
  }
}

</mosaic_0001>

<bundles_post_ra>
// kernel: squeeze.2
= control target key start
LH: loop header
LB: loop body
LE: loop exit
PB: predicated region body
PF: predicated region fallthrough
CT: control target
= control target key end

     0   :  { %s67_s8 = smov 122   ;;  %vm8_vm0 = vcmask 15360   ;;  %s68_s11 = smov 124   ;;  %s118_s0 = inlined_call_operand.vmem [shape: f32[16], index: 0, kind: input, shape index: {}]   ;;  %s119_s1 = inlined_call_operand.vmem [shape: f32[8,2], index: 1, kind: output, shape index: {}]  }
   0x1   :  { %v5_v0 = vld [vmem:[%s118_s0] sm:$0x1]  ;;  %s66_s0 = smov 126   ;;  %s69_s12 = smov 120  }
   0x2   :  { %6 = vst [vmem:[#allocation0] sm:$0x1] %v5_v0  ;;  %s70_s13 = smov 118   ;;  %s71_s14 = smov 116  }
   0x3   :  { %s72_s15 = smov 114  }
   0x9   :  { %v10_v1 = vld [vmem:[#allocation0] sm:$0x1]  }
   0xa   :  { %v22_v2 = vld [vmem:[#allocation0] sm:$0x1]   ;;  %11 = vrot.lane.b32.xlu0 %v10_v1, %s66_s0 }
   0xb   :  { %23 = vrot.lane.b32.xlu1 %v22_v2, %s67_s8  ;;  %v16_v3 = vld [vmem:[#allocation0] sm:$0x1]  }
   0xc   :  { %v28_v4 = vld [vmem:[#allocation0] sm:$0x1]  }
   0xd   :  { %v7_v5 = vld [vmem:[#allocation0] sm:$0x1]  }
   0xe   :  { %9 = vst.msk [vmem:[%s119_s1] sm:$0x1] %vm8_vm0, %v7_v5   ;;  %17 = vrot.lane.b32.xlu0 %v16_v3, %s68_s11  ;;  %v34_v6 = vld [vmem:[#allocation0] sm:$0x1]  }
   0xf   :  { %29 = vrot.lane.b32.xlu1 %v28_v4, %s69_s12  ;;  %v40_v7 = vld [vmem:[#allocation0] sm:$0x1]  }
  0x10   :  { %v46_v8 = vld [vmem:[#allocation0] sm:$0x1]  }
  0x12   :  { %35 = vrot.lane.b32.xlu0 %v34_v6, %s70_s13 }
  0x13   :  { %41 = vrot.lane.b32.xlu1 %v40_v7, %s71_s14 }
  0x16   :  { %47 = vrot.lane.b32.xlu0 %v46_v8, %s72_s15 }
  0x7c   :  { %v12_v9 = vpop.permute.xlu0 %11  }
  0x7d   :  { %v24_v10 = vpop.permute.xlu1 %23   ;;  %52 = vst.msk [vmem:[%s119_s1 + $0x1] sm:$0x1] %vm8_vm0, %v12_v9  }
  0x7e   :  { %54 = vst.msk [vmem:[%s119_s1 + $0x3] sm:$0x1] %vm8_vm0, %v24_v10  }
  0x80   :  { %v18_v11 = vpop.permute.xlu0 %17  }
  0x81   :  { %v30_v12 = vpop.permute.xlu1 %29   ;;  %53 = vst.msk [vmem:[%s119_s1 + $0x2] sm:$0x1] %vm8_vm0, %v18_v11  }
  0x82   :  { %55 = vst.msk [vmem:[%s119_s1 + $0x4] sm:$0x1] %vm8_vm0, %v30_v12  }
  0x84   :  { %v36_v13 = vpop.permute.xlu0 %35  }
  0x85   :  { %v42_v14 = vpop.permute.xlu1 %41   ;;  %56 = vst.msk [vmem:[%s119_s1 + $0x5] sm:$0x1] %vm8_vm0, %v36_v13  }
  0x86   :  { %57 = vst.msk [vmem:[%s119_s1 + $0x6] sm:$0x1] %vm8_vm0, %v42_v14  }
  0x88   :  { %v48_v15 = vpop.permute.xlu0 %47  }
  0x89   :  { %58 = vst.msk [vmem:[%s119_s1 + $0x7] sm:$0x1] %vm8_vm0, %v48_v15  }

// kernel: cppo_forward.1
= control target key start
LH: loop header
LB: loop body
LE: loop exit
PB: predicated region body
PF: predicated region fallthrough
CT: control target
= control target key end

     0   :  { %v45_v4 = vlaneseq  ;;  %vm59_vm0 = vcmask 130048   ;;  %s1684_s28 = smov 112   ;;  %vm147_vm1 = vcmask 261120   ;;  %vm237_vm2 = vcmask 64512   ;;  %s1688_s23 = smov 32   ;;  %s1974_s1 = inlined_call_operand.vmem [shape: f32[160,128], index: 1, kind: input, shape index: {}]   ;;  %s1975_s0 = inlined_call_operand.vmem [shape: f32[16,32], index: 0, kind: input, shape index: {}]   ;;  %s1976_s2 = inlined_call_operand.vmem [shape: f32[24,128], index: 2, kind: output, shape index: {}]  }
   0x1   :  { %v19_v0 = vld [vmem:[%s1974_s1 + $0x10] sm:$0xff]  ;;  %v18_v1 = vld [vmem:[%s1974_s1 + $0x8] sm:$0xff]  ;;  %v14_v2 = vld [vmem:[%s1974_s1 + $0x1] sm:$0x1]  ;;  %v1685_v33 = vmov 0.0   ;;  %vm1686_vm3 = vmmov 0  }
   0x2   :  { %1468 = vmatprep.subr.mxu0 %v19_v0  ;;  %v37_v3 = vmax.f32 %v14_v2, 1e-06  ;;  %v46_v5 = vshrl.u32 %v45_v4, 7  ;;  %v11_v6 = vld [vmem:[%s1975_s0] sm:$0xff]  ;;  %v12_v7 = vld [vmem:[%s1975_s0 + $0x8] sm:$0xff]  ;;  %v23_v18 = vld [vmem:[%s1974_s1 + $0x30] sm:$0xff] }
   0x3   :  { %1469 = vmatpush3.msra.mxu0 %v19_v0  ;;  %v1372_v8 = vld [vmem:[%s1974_s1] ss:$0 sm:$0xff]  ;;  %v22_v19 = vld [vmem:[%s1974_s1 + $0x28] sm:$0xff]  ;;  %1475 = vmatprep.subr.mxu1 %v23_v18  ;;  %v20_v21 = vld [vmem:[%s1974_s1 + $0x18] sm:$0xff]  ;;  %s1687_s0 = smov 64   ;;  %vm1240_vm4 = vcmask 1041408  }
   0x4   :  { %1470 = vmatprep.subr.mxu0 %v18_v1  ;;  %1606 = vrsqrt.f32 %v37_v3  ;;  %v47_v9 = vsub.s32 0, %v46_v5  ;;  %v43_v10 = vsub.f32 %v11_v6, %v1372_v8  ;;  %v44_v11 = vsub.f32 %v12_v7, %v1372_v8  ;;  %1476 = vmatpush3.msra.mxu1 %v23_v18  ;;  %v21_v20 = vld [vmem:[%s1974_s1 + $0x20] sm:$0xff]  ;;  %v28_v30 = vld [vmem:[%s1974_s1 + $0x58] sm:$0xff]  ;;  %v27_v31 = vld [vmem:[%s1974_s1 + $0x50] sm:$0xff] }
   0x5   :  { %1471 = vmatpush3.msra.mxu0 %v18_v1  ;;  %1477 = vmatprep.subr.mxu1 %v22_v19  ;;  %v1375_v22 = vld [vmem:[%s1974_s1 + $0x2] ss:$0 sm:$0xff]  ;;  %v1749_v32 = vld [vmem:[%s1974_s1 + $0x78] sm:$0xff]  ;;  %v1755_v34 = vld [vmem:[%s1974_s1 + $0x70] sm:$0xff]  ;;  %vm1242_vm5 = vcmask 1043456   ;;  %vm1244_vm6 = vcmask 1045504  }
   0x6   :  { %1478 = vmatpush3.msra.mxu1 %v22_v19  ;;  %233 = vrot.lane.b32.xlu0 %v11_v6, %s1684_s28  ;;  %v26_v36 = vld [vmem:[%s1974_s1 + $0x48] sm:$0xff]  ;;  %v25_v37 = vld [vmem:[%s1974_s1 + $0x40] sm:$0xff]  ;;  %v24_v38 = vld [vmem:[%s1974_s1 + $0x38] sm:$0xff]  ;;  %vm1366_vm7 = vcmask 257024  }
   0x7   :  { %1479 = vmatprep.subr.mxu1 %v21_v20  ;;  %1486 = vmatprep.subr.mxu0 %v28_v30  ;;  %v1773_v39 = vld [vmem:[%s1974_s1 + $0x68] sm:$0xff]  ;;  %v1781_v40 = vld [vmem:[%s1974_s1 + $0x60] sm:$0xff] }
   0x8   :  { %1480 = vmatpush3.msra.mxu1 %v21_v20  ;;  %v1378_v41 = vld [vmem:[%s1974_s1 + $0x3] ss:$0 sm:$0xff] }
   0x9   :  { %1481 = vmatprep.subr.mxu1 %v20_v21 }
   0xa   :  { %1482 = vmatpush3.msra.mxu1 %v20_v21  ;;  %235 = vrot.lane.b32.xlu0 %v12_v7, %s1684_s28 }
   0xb   :  { %1502 = vmatprep.subr.mxu1 %v1685_v33 }
  0x11   :  { %v1607_v12 = vpop.eup %1606 }
  0x12   :  { %v48_v13 = vrot.slane %v1607_v12, %v47_v9 }
  0x14   :  { %v49_v14 = vmul.f32 %v48_v13, %v43_v10  ;;  %v50_v15 = vmul.f32 %v48_v13, %v44_v11 }
  0x16   :  { %v1373_v16 = vclamps-f32 %v49_v14, 10.0  ;;  %v1374_v17 = vclamps-f32 %v50_v15, 10.0 }
  0x18   :  { %1472 = vmatprep.mubr.msk.f32.mxu0 %vm59_vm0, %v1373_v16 }
  0x19   :  { %1473 = vmatmul.mubr.msk.f32.vlgmr.msra.gmra.mxu0 %vm59_vm0, %v1374_v17 }
  0x1a   :  { %1487 = vmatpush3.msra.mxu0 %v28_v30 }
  0x1b   :  { %1491 = vmatprep.subr.mxu0 %v27_v31 }
  0x78   :  { %v234_v29 = vpop.permute.xlu0 %233 }
  0x79   :  { %1488 = vmatprep.mubr.msk.f32.mxu0 %vm237_vm2, %v234_v29 }
  0x7c   :  { %v236_v35 = vpop.permute.xlu0 %235 }
  0x7d   :  { %1489 = vmatmul.mubr.msk.f32.vlgmr.msra.gmra.mxu0 %vm237_vm2, %v236_v35 }
  0x7e   :  { %1492 = vmatpush3.msra.mxu0 %v27_v31 }
  0x7f   :  { %1493 = vmatprep.subr.mxu0 %v26_v36 }
  0x80   :  { %1494 = vmatpush3.msra.mxu0 %v26_v36 }
  0x81   :  { %1495 = vmatprep.subr.mxu0 %v25_v37 }
  0x82   :  { %1496 = vmatpush3.msra.mxu0 %v25_v37 }
  0x83   :  { %1497 = vmatprep.subr.mxu0 %v24_v38 }
  0x84   :  { %1498 = vmatpush3.msra.mxu0 %v24_v38 }
  0x85   :  { %1513 = vmatprep.subr.mxu0 %v1685_v33 }
  0xd9   :  { %v1474_v23 = vpop.f32.mrf.mxu0 }
  0xda   :  { %v138_v24 = vadd.f32 %v1474_v23, %v1375_v22 }
  0xdb   :  { %v132_v25 = vpop.f32.mrf.mxu0 }
  0xdc   :  { %v133_v26 = vadd.f32 %v1375_v22, %v132_v25 }
  0xde   :  { %1608 = vtanh.f32 %v133_v26 }
  0xdf   :  { %1610 = vtanh.f32 %v138_v24 }
  0xeb   :  { %v1609_v27 = vpop.eup %1608 }
  0xec   :  { %v1611_v28 = vpop.eup %1610  ;;  %1483 = vmatprep.mubr.msk.f32.mxu1 %vm147_vm1, %v1609_v27 }
  0xed   :  { %1484 = vmatmul.mubr.msk.f32.vlgmr.msra.gmra.mxu1 %vm147_vm1, %v1611_v28 }
  0xee   :  { %1503 = vmatpush3.msra.mxu1 %v1749_v32  ;;  %1510 = vmatprep.mubr.msk.f32.mxu1 %vm1686_vm3, %v1685_v33 }
  0xef   :  { %1504 = vmatprep.subr.mxu1 %v1685_v33 }
  0xf0   :  { %1505 = vmatpush3.msra.mxu1 %v1755_v34 }
  0xf1   :  { %1506 = vmatprep.subr.mxu1 %v1685_v33 }
  0xf2   :  { %1507 = vmatpush3.msra.mxu1 %v1773_v39 }
  0xf3   :  { %1508 = vmatprep.subr.mxu1 %v1685_v33 }
  0xf4   :  { %1509 = vmatpush3.msra.mxu1 %v1781_v40 }
  0xf5   :  { %1511 = vmatmul.mubr.f32.vlgmr.msra.gmra.mxu1 %v1685_v33  ;;  %1524 = vmatprep.subr.mxu1 %v1685_v33 }
  0xf6   :  { %1525 = vmatpush3.msra.mxu1 %v1749_v32  ;;  %1532 = vmatprep.mubr.msk.f32.mxu1 %vm1686_vm3, %v1685_v33 }
  0xf7   :  { %1526 = vmatprep.subr.mxu1 %v1685_v33 }
  0xf8   :  { %1527 = vmatpush3.msra.mxu1 %v1755_v34 }
  0xf9   :  { %1528 = vmatprep.subr.mxu1 %v1685_v33 }
  0xfa   :  { %1529 = vmatpush3.msra.mxu1 %v1773_v39 }
  0xfb   :  { %1530 = vmatprep.subr.mxu1 %v1685_v33 }
  0xfc   :  { %1531 = vmatpush3.msra.mxu1 %v1781_v40 }
  0xfd   :  { %1546 = vmatprep.subr.mxu1 %v1685_v33 }
 0x13d   :  { %v1819_v50 = vpop.f32.mrf.mxu0 }
 0x13f   :  { %v308_v51 = vpop.f32.mrf.mxu0 }
 0x1ad   :  { %v1485_v42 = vpop.f32.mrf.mxu1 }
 0x1ae   :  { %v226_v43 = vadd.f32 %v1485_v42, %v1378_v41 }
 0x1af   :  { %v220_v44 = vpop.f32.mrf.mxu1 }
 0x1b0   :  { %v221_v45 = vadd.f32 %v1378_v41, %v220_v44 }
 0x1b2   :  { %1612 = vtanh.f32 %v221_v45 }
 0x1b3   :  { %1614 = vtanh.f32 %v226_v43 }
 0x1b5   :  { %v467_v48 = vpop.f32.mrf.mxu1 }
 0x1b7   :  { %v1512_v49 = vpop.f32.mrf.mxu1 }
 0x1bf   :  { %v1801_v46 = vpop.eup %1612 }
 0x1c0   :  { %v1803_v47 = vpop.eup %1614  ;;  %1499 = vmatprep.mubr.msk.f32.mxu0 %vm147_vm1, %v1801_v46 }
 0x1c1   :  { %1500 = vmatmul.mubr.msk.f32.vlgmr.msra.gmra.mxu0 %vm147_vm1, %v1803_v47 }
 0x1c2   :  { %1514 = vmatpush3.msra.mxu0 %v1749_v32  ;;  %1521 = vmatprep.mubr.msk.f32.mxu0 %vm1686_vm3, %v1685_v33 }
 0x1c3   :  { %1515 = vmatprep.subr.mxu0 %v1685_v33 }
 0x1c4   :  { %1516 = vmatpush3.msra.mxu0 %v1755_v34 }
 0x1c5   :  { %1517 = vmatprep.subr.mxu0 %v1685_v33 }
 0x1c6   :  { %1518 = vmatpush3.msra.mxu0 %v1773_v39 }
 0x1c7   :  { %1519 = vmatprep.subr.mxu0 %v1685_v33 }
 0x1c8   :  { %1520 = vmatpush3.msra.mxu0 %v1781_v40 }
 0x1c9   :  { %1535 = vmatprep.subr.mxu0 %v1685_v33 }
 0x281   :  { %v1821_v52 = vpop.f32.mrf.mxu0 }
 0x283   :  { %v389_v53 = vpop.f32.mrf.mxu0 }
 0x284   :  { %v1823_v54 = vadd.f32 %v389_v53, %v308_v51 }
 0x286   :  { %v471_v55 = vadd.f32 %v467_v48, %v1823_v54 }
 0x288   :  { %1616 = vtanh.f32 %v471_v55  ;;  %v1385_v57 = vmul.f32 -1.442695, %v471_v55 }
 0x28a   :  { %1618 = vpow2.f32 %v1385_v57 }
 0x295   :  { %v1617_v56 = vpop.eup %1616 }
 0x296   :  { %481 = vrot.lane.b32.xlu1 %v1617_v56, %s1687_s0 }
 0x297   :  { %v1619_v58 = vpop.eup %1618 }
 0x298   :  { %v475_v59 = vadd.f32 1.0, %v1619_v58 }
 0x29a   :  { %1620 = vrcp.f32 %v475_v59 }
 0x2a7   :  { %v1621_v60 = vpop.eup %1620 }
 0x2a8   :  { %v479_v63 = vmul.f32 0.0, %v1621_v60 }
 0x308   :  { %v482_v61 = vpop.permute.xlu1 %481 }
 0x309   :  { %v484_v62 = vmul.f32 %v1621_v60, %v482_v61 }
 0x30b   :  { %486 = vrot.lane.b32.xlu1 %v484_v62, %s1688_s23 }
 0x37d   :  { %v487_v0 = vpop.permute.xlu1 %486 }
 0x37e   :  { %v489_v1 = vadd.f32 %v487_v0, %v479_v63 }
 0x380   :  { %1622 = vtanh.f32 %v489_v1  ;;  %v583_v18 = vrot.slane %v489_v1, 6 }
 0x38d   :  { %v1623_v2 = vpop.eup %1622 }
 0x38e   :  { %492 = vrot.lane.b32.xlu0 %v1623_v2, %s1687_s0 }
 0x400   :  { %v493_v3 = vpop.permute.xlu0 %492 }
 0x401   :  { %v1829_v5 = vmul.f32 %v1621_v60, %v493_v3 }
 0x403   :  { %497 = vrot.lane.b32.xlu1 %v1829_v5, %s1688_s23 }
 0x475   :  { %v498_v6 = vpop.permute.xlu1 %497 }
 0x476   :  { %1522 = vmatmul.mubr.msk.f32.vlgmr.msra.gmra.mxu0 %vm147_vm1, %v498_v6 }
 0x477   :  { %1536 = vmatpush3.msra.mxu0 %v1749_v32  ;;  %1543 = vmatprep.mubr.msk.f32.mxu0 %vm1686_vm3, %v1685_v33 }
 0x478   :  { %1537 = vmatprep.subr.mxu0 %v1685_v33 }
 0x479   :  { %1538 = vmatpush3.msra.mxu0 %v1755_v34 }
 0x47a   :  { %1539 = vmatprep.subr.mxu0 %v1685_v33 }
 0x47b   :  { %1540 = vmatpush3.msra.mxu0 %v1773_v39 }
 0x47c   :  { %1541 = vmatprep.subr.mxu0 %v1685_v33 }
 0x47d   :  { %1542 = vmatpush3.msra.mxu0 %v1781_v40 }
 0x47e   :  { %1557 = vmatprep.subr.mxu0 %v1685_v33 }
 0x536   :  { %v567_v7 = vpop.f32.mrf.mxu0 }
 0x537   :  { %v572_v8 = vrot.slane %v567_v7, 6 }
 0x538   :  { %v1523_v9 = vpop.f32.mrf.mxu0 }
 0x539   :  { %v574_v10 = vadd.f32 %v572_v8, %v1823_v54 }
 0x53b   :  { %1624 = vtanh.f32 %v574_v10  ;;  %v1387_v12 = vmul.f32 -1.442695, %v574_v10 }
 0x53d   :  { %1626 = vpow2.f32 %v1387_v12 }
 0x548   :  { %v1625_v11 = vpop.eup %1624 }
 0x549   :  { %587 = vrot.lane.b32.xlu0 %v1625_v11, %s1687_s0 }
 0x54a   :  { %v1627_v13 = vpop.eup %1626 }
 0x54b   :  { %v578_v14 = vadd.f32 1.0, %v1627_v13 }
 0x54d   :  { %1628 = vrcp.f32 %v578_v14 }
 0x55a   :  { %v1629_v15 = vpop.eup %1628 }
 0x55b   :  { %v585_v19 = vmul.f32 %v1629_v15, %v583_v18 }
 0x5bb   :  { %v588_v16 = vpop.permute.xlu0 %587 }
 0x5bc   :  { %v590_v17 = vmul.f32 %v1629_v15, %v588_v16  ;;  %v1899_v16 = vadd.f32 %v1821_v52, %v1819_v50 }
 0x5be   :  { %592 = vrot.lane.b32.xlu1 %v590_v17, %s1688_s23 }
 0x630   :  { %v593_v20 = vpop.permute.xlu1 %592 }
 0x631   :  { %v595_v21 = vadd.f32 %v593_v20, %v585_v19 }
 0x633   :  { %1630 = vtanh.f32 %v595_v21  ;;  %v690_v43 = vrot.slane %v595_v21, 6 }
 0x640   :  { %v1631_v22 = vpop.eup %1630 }
 0x641   :  { %598 = vrot.lane.b32.xlu0 %v1631_v22, %s1687_s0 }
 0x6b3   :  { %v599_v23 = vpop.permute.xlu0 %598 }
 0x6b4   :  { %v601_v24 = vmul.f32 %v1629_v15, %v599_v23 }
 0x6b6   :  { %v603_v25 = vrot.slane %v601_v24, 2  ;;  %v1241_v55 = vsel %vm1240_vm4, %v1829_v5, %v601_v24 }
 0x6b8   :  { %604 = vrot.lane.b32.xlu1 %v603_v25, %s1688_s23 }
 0x72a   :  { %v605_v26 = vpop.permute.xlu1 %604 }
 0x72b   :  { %1533 = vmatmul.mubr.msk.f32.vlgmr.msra.gmra.mxu1 %vm147_vm1, %v605_v26 }
 0x72c   :  { %1547 = vmatpush3.msra.mxu1 %v1749_v32  ;;  %1554 = vmatprep.mubr.msk.f32.mxu1 %vm1686_vm3, %v1685_v33 }
 0x72d   :  { %1548 = vmatprep.subr.mxu1 %v1685_v33 }
 0x72e   :  { %1549 = vmatpush3.msra.mxu1 %v1755_v34 }
 0x72f   :  { %1550 = vmatprep.subr.mxu1 %v1685_v33 }
 0x730   :  { %1551 = vmatpush3.msra.mxu1 %v1773_v39 }
 0x731   :  { %1552 = vmatprep.subr.mxu1 %v1685_v33 }
 0x732   :  { %1553 = vmatpush3.msra.mxu1 %v1781_v40 }
 0x733   :  { %1568 = vmatprep.subr.mxu1 %v1685_v33 }
 0x7eb   :  { %v674_v27 = vpop.f32.mrf.mxu1 }
 0x7ec   :  { %v679_v28 = vrot.slane %v674_v27, 4 }
 0x7ed   :  { %v1534_v29 = vpop.f32.mrf.mxu1 }
 0x7ee   :  { %v681_v30 = vadd.f32 %v679_v28, %v1823_v54 }
 0x7f0   :  { %1632 = vtanh.f32 %v681_v30  ;;  %v1389_v35 = vmul.f32 -1.442695, %v681_v30 }
 0x7f2   :  { %1634 = vpow2.f32 %v1389_v35 }
 0x7fd   :  { %v1633_v31 = vpop.eup %1632 }
 0x7fe   :  { %694 = vrot.lane.b32.xlu0 %v1633_v31, %s1687_s0 }
 0x7ff   :  { %v1635_v36 = vpop.eup %1634 }
 0x800   :  { %v685_v37 = vadd.f32 1.0, %v1635_v36 }
 0x802   :  { %1636 = vrcp.f32 %v685_v37 }
 0x80f   :  { %v1637_v38 = vpop.eup %1636 }
 0x810   :  { %v692_v44 = vmul.f32 %v1637_v38, %v690_v43 }
 0x870   :  { %v695_v41 = vpop.permute.xlu0 %694 }
 0x871   :  { %v697_v42 = vmul.f32 %v1637_v38, %v695_v41 }
 0x873   :  { %699 = vrot.lane.b32.xlu1 %v697_v42, %s1688_s23 }
 0x8e5   :  { %v700_v45 = vpop.permute.xlu1 %699 }
 0x8e6   :  { %v702_v48 = vadd.f32 %v700_v45, %v692_v44 }
 0x8e8   :  { %1638 = vtanh.f32 %v702_v48  ;;  %v797_v7 = vrot.slane %v702_v48, 6 }
 0x8f5   :  { %v1639_v49 = vpop.eup %1638 }
 0x8f6   :  { %705 = vrot.lane.b32.xlu0 %v1639_v49, %s1687_s0 }
 0x968   :  { %v706_v51 = vpop.permute.xlu0 %705 }
 0x969   :  { %v708_v53 = vmul.f32 %v1637_v38, %v706_v51 }
 0x96b   :  { %v710_v56 = vrot.slane %v708_v53, 4  ;;  %v1243_v57 = vsel %vm1242_vm5, %v1241_v55, %v708_v53 }
 0x96d   :  { %711 = vrot.lane.b32.xlu1 %v710_v56, %s1688_s23 }
 0x9df   :  { %v712_v58 = vpop.permute.xlu1 %711 }
 0x9e0   :  { %1544 = vmatmul.mubr.msk.f32.vlgmr.msra.gmra.mxu0 %vm147_vm1, %v712_v58 }
 0x9e1   :  { %1558 = vmatpush3.msra.mxu0 %v1749_v32  ;;  %1565 = vmatprep.mubr.msk.f32.mxu0 %vm1686_vm3, %v1685_v33 }
 0x9e2   :  { %1559 = vmatprep.subr.mxu0 %v1685_v33 }
 0x9e3   :  { %1560 = vmatpush3.msra.mxu0 %v1755_v34 }
 0x9e4   :  { %1561 = vmatprep.subr.mxu0 %v1685_v33 }
 0x9e5   :  { %1562 = vmatpush3.msra.mxu0 %v1773_v39 }
 0x9e6   :  { %1563 = vmatprep.subr.mxu0 %v1685_v33 }
 0x9e7   :  { %1564 = vmatpush3.msra.mxu0 %v1781_v40 }
 0x9e8   :  { %1579 = vmatprep.subr.mxu0 %v1685_v33 }
 0xaa0   :  { %v781_v59 = vpop.f32.mrf.mxu0 }
 0xaa1   :  { %v786_v60 = vrot.slane %v781_v59, 2 }
 0xaa2   :  { %v1545_v61 = vpop.f32.mrf.mxu0 }
 0xaa3   :  { %v788_v62 = vadd.f32 %v786_v60, %v1823_v54 }
 0xaa5   :  { %1640 = vtanh.f32 %v788_v62  ;;  %v1391_v0 = vmul.f32 -1.442695, %v788_v62 }
 0xaa7   :  { %1642 = vpow2.f32 %v1391_v0 }
 0xab2   :  { %v1641_v63 = vpop.eup %1640 }
 0xab3   :  { %801 = vrot.lane.b32.xlu0 %v1641_v63, %s1687_s0 }
 0xab4   :  { %v1643_v1 = vpop.eup %1642 }
 0xab5   :  { %v792_v2 = vadd.f32 1.0, %v1643_v1 }
 0xab7   :  { %1644 = vrcp.f32 %v792_v2 }
 0xac4   :  { %v1645_v3 = vpop.eup %1644 }
 0xac5   :  { %v799_v8 = vmul.f32 %v1645_v3, %v797_v7 }
 0xb25   :  { %v802_v5 = vpop.permute.xlu0 %801 }
 0xb26   :  { %v804_v6 = vmul.f32 %v1645_v3, %v802_v5 }
 0xb28   :  { %806 = vrot.lane.b32.xlu1 %v804_v6, %s1688_s23 }
 0xb9a   :  { %v807_v9 = vpop.permute.xlu1 %806 }
 0xb9b   :  { %v809_v10 = vadd.f32 %v807_v9, %v799_v8 }
 0xb9d   :  { %1646 = vtanh.f32 %v809_v10  ;;  %v901_v50 = vrot.slane %v809_v10, 6 }
 0xbaa   :  { %v1647_v54 = vpop.eup %1646 }
 0xbab   :  { %812 = vrot.lane.b32.xlu0 %v1647_v54, %s1687_s0 }
 0xc1d   :  { %v813_v11 = vpop.permute.xlu0 %812 }
 0xc1e   :  { %v815_v12 = vmul.f32 %v1645_v3, %v813_v11 }
 0xc20   :  { %v817_v13 = vrot.slane %v815_v12, 6  ;;  %v1884_v14 = vsel %vm1244_vm6, %v1243_v57, %v815_v12 }
 0xc22   :  { %818 = vrot.lane.b32.xlu1 %v817_v13, %s1688_s23 }
 0xc94   :  { %v819_v15 = vpop.permute.xlu1 %818 }
 0xc95   :  { %1555 = vmatmul.mubr.msk.f32.vlgmr.msra.gmra.mxu1 %vm147_vm1, %v819_v15 }
 0xc96   :  { %1569 = vmatpush3.msra.mxu1 %v1749_v32  ;;  %1576 = vmatprep.mubr.msk.f32.mxu1 %vm1686_vm3, %v1685_v33 }
 0xc97   :  { %1570 = vmatprep.subr.mxu1 %v1685_v33 }
 0xc98   :  { %1571 = vmatpush3.msra.mxu1 %v1755_v34 }
 0xc99   :  { %1572 = vmatprep.subr.mxu1 %v1685_v33 }
 0xc9a   :  { %1573 = vmatpush3.msra.mxu1 %v1773_v39 }
 0xc9b   :  { %1574 = vmatprep.subr.mxu1 %v1685_v33 }
 0xc9c   :  { %1575 = vmatpush3.msra.mxu1 %v1781_v40 }
 0xd55   :  { %v888_v17 = vpop.f32.mrf.mxu1 }
 0xd56   :  { %v892_v18 = vadd.f32 %v888_v17, %v1899_v16 }
 0xd57   :  { %v1556_v19 = vpop.f32.mrf.mxu1 }
 0xd58   :  { %1648 = vtanh.f32 %v892_v18  ;;  %v1393_v21 = vmul.f32 -1.442695, %v892_v18 }
 0xd5a   :  { %1650 = vpow2.f32 %v1393_v21 }
 0xd65   :  { %v1649_v20 = vpop.eup %1648 }
 0xd66   :  { %905 = vrot.lane.b32.xlu0 %v1649_v20, %s1687_s0 }
 0xd67   :  { %v1651_v22 = vpop.eup %1650 }
 0xd68   :  { %v896_v23 = vadd.f32 1.0, %v1651_v22 }
 0xd6a   :  { %1652 = vrcp.f32 %v896_v23 }
 0xd77   :  { %v1653_v24 = vpop.eup %1652 }
 0xd78   :  { %v903_v52 = vmul.f32 %v1653_v24, %v901_v50 }
 0xdd8   :  { %v906_v25 = vpop.permute.xlu0 %905 }
 0xdd9   :  { %v908_v26 = vmul.f32 %v1653_v24, %v906_v25 }
 0xddb   :  { %910 = vrot.lane.b32.xlu1 %v908_v26, %s1688_s23 }
 0xe4d   :  { %v911_v27 = vpop.permute.xlu1 %910 }
 0xe4e   :  { %v913_v28 = vadd.f32 %v911_v27, %v903_v52 }
 0xe50   :  { %1654 = vtanh.f32 %v913_v28 }
 0xe5d   :  { %v1655_v29 = vpop.eup %1654 }
 0xe5e   :  { %916 = vrot.lane.b32.xlu0 %v1655_v29, %s1687_s0 }
 0xed0   :  { %v917_v30 = vpop.permute.xlu0 %916 }
 0xed1   :  { %v1905_v31 = vmul.f32 %v1653_v24, %v917_v30 }
 0xed3   :  { %921 = vrot.lane.b32.xlu1 %v1905_v31, %s1688_s23 }
 0xf45   :  { %v922_v35 = vpop.permute.xlu1 %921 }
 0xf46   :  { %1566 = vmatmul.mubr.msk.f32.vlgmr.msra.gmra.mxu0 %vm147_vm1, %v922_v35 }
 0xf47   :  { %1580 = vmatpush3.msra.mxu0 %v1749_v32  ;;  %1587 = vmatprep.mubr.msk.f32.mxu0 %vm1686_vm3, %v1685_v33 }
 0xf48   :  { %1581 = vmatprep.subr.mxu0 %v1685_v33 }
 0xf49   :  { %1582 = vmatpush3.msra.mxu0 %v1755_v34 }
 0xf4a   :  { %1583 = vmatprep.subr.mxu0 %v1685_v33 }
 0xf4b   :  { %1584 = vmatpush3.msra.mxu0 %v1773_v39 }
 0xf4c   :  { %1585 = vmatprep.subr.mxu0 %v1685_v33  ;;  %v1007_v33 = vrot.slane %v913_v28, 6 }
 0xf4d   :  { %1586 = vmatpush3.msra.mxu0 %v1781_v40 }
0x1006   :  { %v991_v36 = vpop.f32.mrf.mxu0 }
0x1007   :  { %v996_v37 = vrot.slane %v991_v36, 6  ;;  %v36_v36 = vld [vmem:[%s1974_s1 + $0x98] sm:$0xff] }
0x1008   :  { %v1567_v38 = vpop.f32.mrf.mxu0  ;;  %1590 = vmatprep.subr.mxu1 %v36_v36 }
0x1009   :  { %v998_v32 = vadd.f32 %v996_v37, %v1899_v16  ;;  %v34_v37 = vld [vmem:[%s1974_s1 + $0x88] sm:$0xff]  ;;  %v33_v38 = vld [vmem:[%s1974_s1 + $0x80] sm:$0xff] }
0x100b   :  { %1656 = vtanh.f32 %v998_v32  ;;  %v1395_v42 = vmul.f32 -1.442695, %v998_v32 }
0x100d   :  { %1658 = vpow2.f32 %v1395_v42 }
0x1018   :  { %v1657_v41 = vpop.eup %1656 }
0x1019   :  { %1011 = vrot.lane.b32.xlu0 %v1657_v41, %s1687_s0 }
0x101a   :  { %v1659_v34 = vpop.eup %1658 }
0x101b   :  { %v1002_v43 = vadd.f32 1.0, %v1659_v34 }
0x101d   :  { %1660 = vrcp.f32 %v1002_v43 }
0x102a   :  { %v1661_v44 = vpop.eup %1660 }
0x102b   :  { %v1009_v40 = vmul.f32 %v1661_v44, %v1007_v33 }
0x108b   :  { %v1012_v39 = vpop.permute.xlu0 %1011 }
0x108c   :  { %v1014_v45 = vmul.f32 %v1661_v44, %v1012_v39 }
0x108e   :  { %1016 = vrot.lane.b32.xlu1 %v1014_v45, %s1688_s23 }
0x1100   :  { %v1017_v48 = vpop.permute.xlu1 %1016 }
0x1101   :  { %v1019_v49 = vadd.f32 %v1017_v48, %v1009_v40  ;;  %v1400_v40 = vld [vmem:[%s1974_s1 + $0x4] ss:$0 sm:$0xff] }
0x1103   :  { %1662 = vtanh.f32 %v1019_v49  ;;  %v1114_v6 = vrot.slane %v1019_v49, 6 }
0x1110   :  { %v1663_v51 = vpop.eup %1662 }
0x1111   :  { %1022 = vrot.lane.b32.xlu0 %v1663_v51, %s1687_s0 }
0x1183   :  { %v1023_v53 = vpop.permute.xlu0 %1022 }
0x1184   :  { %v1025_v55 = vmul.f32 %v1661_v44, %v1023_v53 }
0x1186   :  { %v1027_v56 = vrot.slane %v1025_v55, 2  ;;  %v1246_v12 = vsel %vm1240_vm4, %v1905_v31, %v1025_v55 }
0x1188   :  { %1028 = vrot.lane.b32.xlu1 %v1027_v56, %s1688_s23 }
0x11fa   :  { %v1029_v57 = vpop.permute.xlu1 %1028 }
0x11fb   :  { %1577 = vmatmul.mubr.msk.f32.vlgmr.msra.gmra.mxu1 %vm147_vm1, %v1029_v57 }
0x11fc   :  { %1591 = vmatpush3.msra.mxu1 %v36_v36 }
0x12bb   :  { %v1098_v58 = vpop.f32.mrf.mxu1 }
0x12bc   :  { %v1103_v59 = vrot.slane %v1098_v58, 4 }
0x12bd   :  { %v1578_v60 = vpop.f32.mrf.mxu1 }
0x12be   :  { %v1105_v61 = vadd.f32 %v1103_v59, %v1899_v16 }
0x12c0   :  { %1664 = vtanh.f32 %v1105_v61  ;;  %v1397_v63 = vmul.f32 -1.442695, %v1105_v61 }
0x12c2   :  { %1666 = vpow2.f32 %v1397_v63 }
0x12cd   :  { %v1665_v62 = vpop.eup %1664 }
0x12ce   :  { %1118 = vrot.lane.b32.xlu0 %v1665_v62, %s1687_s0 }
0x12cf   :  { %v1667_v0 = vpop.eup %1666 }
0x12d0   :  { %v1109_v1 = vadd.f32 1.0, %v1667_v0 }
0x12d2   :  { %1668 = vrcp.f32 %v1109_v1 }
0x12df   :  { %v1669_v2 = vpop.eup %1668 }
0x12e0   :  { %v1116_v7 = vmul.f32 %v1669_v2, %v1114_v6 }
0x1340   :  { %v1119_v3 = vpop.permute.xlu0 %1118 }
0x1341   :  { %v1121_v5 = vmul.f32 %v1669_v2, %v1119_v3 }
0x1343   :  { %1123 = vrot.lane.b32.xlu1 %v1121_v5, %s1688_s23 }
0x13b5   :  { %v1124_v8 = vpop.permute.xlu1 %1123 }
0x13b6   :  { %v1126_v9 = vadd.f32 %v1124_v8, %v1116_v7 }
0x13b8   :  { %1670 = vtanh.f32 %v1126_v9  ;;  %v1221_v27 = vrot.slane %v1126_v9, 6 }
0x13c5   :  { %v1671_v10 = vpop.eup %1670 }
0x13c6   :  { %1129 = vrot.lane.b32.xlu0 %v1671_v10, %s1687_s0 }
0x1438   :  { %v1130_v54 = vpop.permute.xlu0 %1129 }
0x1439   :  { %v1132_v11 = vmul.f32 %v1669_v2, %v1130_v54 }
0x143b   :  { %v1134_v13 = vrot.slane %v1132_v11, 4  ;;  %v1247_v15 = vsel %vm1242_vm5, %v1246_v12, %v1132_v11 }
0x143d   :  { %1135 = vrot.lane.b32.xlu1 %v1134_v13, %s1688_s23 }
0x14af   :  { %v1136_v17 = vpop.permute.xlu1 %1135 }
0x14b0   :  { %1588 = vmatmul.mubr.msk.f32.vlgmr.msra.gmra.mxu0 %vm147_vm1, %v1136_v17 }
0x1570   :  { %v1205_v18 = vpop.f32.mrf.mxu0 }
0x1571   :  { %v1210_v19 = vrot.slane %v1205_v18, 2 }
0x1572   :  { %v1589_v20 = vpop.f32.mrf.mxu0 }
0x1573   :  { %v1212_v21 = vadd.f32 %v1210_v19, %v1899_v16 }
0x1575   :  { %1672 = vtanh.f32 %v1212_v21  ;;  %v1399_v23 = vmul.f32 -1.442695, %v1212_v21 }
0x1577   :  { %1674 = vpow2.f32 %v1399_v23 }
0x1582   :  { %v1673_v22 = vpop.eup %1672 }
0x1583   :  { %1225 = vrot.lane.b32.xlu0 %v1673_v22, %s1687_s0 }
0x1584   :  { %v1675_v24 = vpop.eup %1674 }
0x1585   :  { %v1216_v25 = vadd.f32 1.0, %v1675_v24 }
0x1587   :  { %1676 = vrcp.f32 %v1216_v25 }
0x1594   :  { %v1677_v26 = vpop.eup %1676 }
0x1595   :  { %v1223_v28 = vmul.f32 %v1677_v26, %v1221_v27 }
0x15f5   :  { %v1226_v50 = vpop.permute.xlu0 %1225 }
0x15f6   :  { %v1228_v52 = vmul.f32 %v1677_v26, %v1226_v50 }
0x15f8   :  { %1230 = vrot.lane.b32.xlu1 %v1228_v52, %s1688_s23 }
0x15fc   :  { %1251 = vrot.lane.b32.xlu1 %v1884_v14, %s1688_s23  ;;  %v35_v14 = vld [vmem:[%s1974_s1 + $0x90] sm:$0xff] }
0x15fd   :  { %1592 = vmatprep.subr.mxu1 %v35_v14 }
0x15fe   :  { %1593 = vmatpush3.msra.mxu1 %v35_v14 }
0x15ff   :  { %1594 = vmatprep.subr.mxu1 %v34_v37 }
0x1600   :  { %1595 = vmatpush3.msra.mxu1 %v34_v37 }
0x1601   :  { %1596 = vmatprep.subr.mxu1 %v33_v38 }
0x1602   :  { %1597 = vmatpush3.msra.mxu1 %v33_v38 }
0x166a   :  { %v1231_v16 = vpop.permute.xlu1 %1230 }
0x166b   :  { %v1233_v29 = vadd.f32 %v1231_v16, %v1223_v28 }
0x166d   :  { %1678 = vtanh.f32 %v1233_v29  ;;  %v1357_v30 = vrot.slane %v1233_v29, 4 }
0x166e   :  { %v1252_v31 = vpop.permute.xlu1 %1251 }
0x166f   :  { %v1257_v35 = vadd.f32 %v1801_v46, %v1252_v31  ;;  %1358 = vrot.lane.b32.xlu1 %v1357_v30, %s1687_s0 }
0x1671   :  { %1598 = vmatprep.mubr.msk.f32.mxu1 %vm147_vm1, %v1257_v35 }
0x167a   :  { %v1679_v46 = vpop.eup %1678 }
0x167b   :  { %1236 = vrot.lane.b32.xlu0 %v1679_v46, %s1687_s0 }
0x16e1   :  { %v1359_v43 = vpop.permute.xlu1 %1358 }
0x16ed   :  { %v1237_v32 = vpop.permute.xlu0 %1236 }
0x16ee   :  { %v1239_v41 = vmul.f32 %v1677_v26, %v1237_v32 }
0x16f0   :  { %v1354_v42 = vrot.slane %v1239_v41, 6  ;;  %v1248_v34 = vsel %vm1244_vm6, %v1247_v15, %v1239_v41 }
0x16f1   :  { %1253 = vrot.lane.b32.xlu0 %v1248_v34, %s1688_s23 }
0x16f2   :  { %v1361_v44 = vsel %vm1240_vm4, %v1354_v42, %v1359_v43 }
0x16f5   :  { %1363 = vrot.lane.b32.xlu0 %v1361_v44, %s1688_s23 }
0x1763   :  { %v1254_v39 = vpop.permute.xlu0 %1253 }
0x1764   :  { %v1258_v45 = vadd.f32 %v1803_v47, %v1254_v39  ;;  %v1345_v47 = vand.u32 127, %v45_v4 }
0x1766   :  { %1599 = vmatmul.mubr.msk.f32.vlgmr.msra.gmra.mxu1 %vm147_vm1, %v1258_v45  ;;  %vm1346_vm8 = vcmp.lt.s32.totalorder %v1345_v47, 4 }
0x1767   :  { %v1364_v33 = vpop.permute.xlu0 %1363 }
0x1768   :  { %1367 = vst.msk [vmem:[%s1976_s2 + $0x10] sm:$0xf] %vm1366_vm7, %v1364_v33 }
0x1826   :  { %v1600_v48 = vpop.f32.mrf.mxu1 }
0x1827   :  { %v1341_v49 = vadd.f32 %v1600_v48, %v1400_v40 }
0x1828   :  { %v1335_v51 = vpop.f32.mrf.mxu1 }
0x1829   :  { %1680 = vtanh.f32 %v1341_v49  ;;  %v1336_v53 = vadd.f32 %v1400_v40, %v1335_v51 }
0x182b   :  { %1682 = vtanh.f32 %v1336_v53 }
0x1836   :  { %v1681_v55 = vpop.eup %1680 }
0x1837   :  { %v1350_v56 = vsel %vm1346_vm8, %v1681_v55, %v1341_v49 }
0x1838   :  { %v1683_v57 = vpop.eup %1682  ;;  %1352 = vst [vmem:[%s1976_s2 + $0x8] sm:$0xff] %v1350_v56 }
0x1839   :  { %v1349_v58 = vsel %vm1346_vm8, %v1683_v57, %v1336_v53 }
0x183a   :  { %1351 = vst [vmem:[%s1976_s2] sm:$0xff] %v1349_v58 }

</bundles_post_ra>
